<compile_context>
chip_gen: v5e
topology: v5e:2x2
jax: 0.10.0
libtpu: 0.0.40
codegen_flags: <defaults>
</compile_context>

<pallas_src>
import math
import functools

import jax
import jax.numpy as jnp
from jax.experimental import pallas as pl
from jax.experimental.pallas import tpu as pltpu

LANE = 128          # TPU lane width (last-dim vreg axis)
MAX_TILE_M = 512    # batch-tile cap (per-step overhead amortized well past 256)
VMEM_CAP = 48 << 20 # conservative resident-weight budget across v5e/v6e/v7x


def _round_up(x, m):
    return ((x + m - 1) // m) * m


def _mlp_kernel(num_layers, out_pads, *refs):
    """refs = (x_ref, w0, ..., w_{L-1}, b_pack_ref, out_ref).

    x_ref   : (TILE_M, input_dim)          f32 activations (NOT lane padded)
    w_l     : (k_pad_l, out_pad_l)         bf16 weights, zero padded, VMEM resident
    b_pack  : (num_layers, max_out_pad)    f32 biases, zero padded
    out_ref : (TILE_M, out_pad_last)       f32
    """
    x_ref = refs[0]
    out_ref = refs[-1]
    b_ref = refs[-2]
    w_refs = refs[1:-2]

    # Cast once; all subsequent matmul operands are bf16 (MXU peak) with f32 acc.
    h = x_ref[...].astype(jnp.bfloat16)
    for layer in range(num_layers):
        w = w_refs[layer][...]  # bf16
        acc = jnp.dot(h, w, preferred_element_type=jnp.float32)
        # Bias add (+ ReLU) in f32 on the VPU (v5e-safe; co-issues with MXU work).
        acc = acc + b_ref[layer:layer + 1, :out_pads[layer]]
        if layer < num_layers - 1:
            h = jnp.maximum(acc, 0.0).astype(jnp.bfloat16)
        else:
            out_ref[...] = acc.astype(out_ref.dtype)


def init_base_network_params(key, input_dim, output_dim, hidden_dims):
    """Xavier-uniform weights / 0.01 biases (matches BaseNetwork._initialize_weights).

    Weights stored as (in, out) so the kernel computes x @ W + b directly."""
    dims = [input_dim] + list(hidden_dims) + [output_dim]
    params = []
    for i in range(len(dims) - 1):
        fan_in, fan_out = dims[i], dims[i + 1]
        key, sub = jax.random.split(key)
        bound = math.sqrt(6.0 / (fan_in + fan_out))
        w = jax.random.uniform(sub, (fan_in, fan_out), jnp.float32, -bound, bound)
        b = jnp.full((1, fan_out), 0.01, jnp.float32)
        params.append((w, b))
    return params


def prepare_base_network_params(params):
    """Zero-pad weights on the lane (fan-out) dim to 128 multiples, cast to bf16,
    and pack biases into one (num_layers, max_out_pad) f32 array.

    Layer 0 keeps its true fan-in (x is NOT lane padded in HBM); deeper layers
    take the previous layer's padded width as fan-in."""
    num_layers = len(params)
    out_dims = [w.shape[1] for w, _ in params]
    out_pads = [_round_up(d, LANE) for d in out_dims]
    max_out_pad = max(out_pads)

    padded_ws = []
    b_pack = jnp.zeros((num_layers, max_out_pad), jnp.float32)
    for l, (w, b) in enumerate(params):
        in_dim = w.shape[0]
        k_pad = in_dim if l == 0 else out_pads[l - 1]
        wp = jnp.zeros((k_pad, out_pads[l]), jnp.float32)
        wp = wp.at[:in_dim, :w.shape[1]].set(w)
        padded_ws.append(wp.astype(jnp.bfloat16))
        b_pack = b_pack.at[l, :b.shape[-1]].set(b.reshape(-1))

    meta = dict(
        input_dim=params[0][0].shape[0],
        output_dim=out_dims[-1],
        out_pads=tuple(out_pads),
    )
    return padded_ws, b_pack, meta


def _pick_batch_tiling(batch):
    """Pick (tile_m, n_tiles) minimizing dead rows; keep grid >= 2 for batch > 256
    so v7x can shard the parallel axis across both TensorCores."""
    n_tiles = max(1, -(-batch // MAX_TILE_M))     # ceil(batch / MAX_TILE_M)
    if batch > 256 and n_tiles == 1:
        n_tiles = 2
    tile_m = _round_up(-(-batch // n_tiles), 8)   # ceil(batch / n_tiles), 8-aligned
    return tile_m, n_tiles


def base_network_forward(x, padded_ws, b_pack, meta):
    """Fused MLP forward pass as a single Pallas TPU kernel."""
    batch, input_dim = x.shape
    assert input_dim == meta["input_dim"]
    num_layers = len(padded_ws)
    out_pads = meta["out_pads"]
    out_pad_last = out_pads[-1]
    output_dim = meta["output_dim"]

    tile_m, n_tiles = _pick_batch_tiling(batch)
    batch_pad = tile_m * n_tiles

    # Only batch-dim padding (no lane padding of x in HBM).
    if batch_pad != batch:
        x_in = jnp.zeros((batch_pad, input_dim), x.dtype).at[:batch, :].set(x)
    else:
        x_in = x

    # Resident-weight VMEM footprint guard (weights/biases stay in VMEM across the
    # whole grid; activation / output blocks are double-buffered by Pallas).
    weight_bytes = sum(2 * math.prod(w.shape) for w in padded_ws)       # bf16
    bias_bytes = 4 * math.prod(b_pack.shape)
    x_block_bytes = 4 * tile_m * input_dim
    out_block_bytes = 4 * tile_m * out_pad_last
    h_bytes = 2 * 4 * tile_m * max(out_pads)                             # headroom
    vmem_needed = 2 * (weight_bytes + bias_bytes + x_block_bytes + out_block_bytes) + h_bytes
    assert vmem_needed <= VMEM_CAP, (
        f"resident weights need ~{vmem_needed >> 20} MiB VMEM; exceeds {VMEM_CAP >> 20} MiB cap")
    # TODO(synk): tile the fan-out (N) dim over a second grid axis when weights exceed the cap.
    vmem_limit = int(min(max(vmem_needed + (4 << 20), 16 << 20), VMEM_CAP))

    grid = (n_tiles,)

    in_specs = [pl.BlockSpec((tile_m, input_dim), lambda i: (i, 0))]
    for wp in padded_ws:
        # Full-array block, same index every grid step -> stays VMEM-resident.
        in_specs.append(pl.BlockSpec(wp.shape, lambda i: (0, 0)))
    in_specs.append(pl.BlockSpec(b_pack.shape, lambda i: (0, 0)))

    out_spec = pl.BlockSpec((tile_m, out_pad_last), lambda i: (i, 0))

    kernel = functools.partial(_mlp_kernel, num_layers, out_pads)

    out_padded = pl.pallas_call(
        kernel,
        out_shape=jax.ShapeDtypeStruct((batch_pad, out_pad_last), jnp.float32),
        grid=grid,
        in_specs=in_specs,
        out_specs=out_spec,
        compiler_params=pltpu.CompilerParams(
            dimension_semantics=("parallel",),
            vmem_limit_bytes=vmem_limit),
    )(x_in, *padded_ws, b_pack)

    return out_padded[:batch, :output_dim]


if __name__ == "__main__":
    # BaseNetwork(input_dim=32, output_dim=16, hidden_dims=[64, 64])
    batch = 8
    input_dim = 32
    hidden_dims = [64, 64]
    output_dim = 16

    key = jax.random.PRNGKey(0)
    key, xkey = jax.random.split(key)
    x = jax.random.normal(xkey, (batch, input_dim), jnp.float32)

    params = init_base_network_params(key, input_dim, output_dim, hidden_dims)
    padded_ws, b_pack, meta = prepare_base_network_params(params)

    out = base_network_forward(x, padded_ws, b_pack, meta)
    out = jax.block_until_ready(out)

    # Plain-JAX f32 reference of the same MLP (kernel uses bf16 matmul operands
    # with f32 accumulation -> loosened tolerance).
    h = x
    for i, (w, b) in enumerate(params):
        h = h @ w + b
        if i < len(params) - 1:
            h = jnp.maximum(h, 0.0)

    assert out.shape == (batch, output_dim)
    assert jnp.allclose(out, h, atol=2e-2, rtol=2e-2), (
        f"max abs err {jnp.max(jnp.abs(out - h))}")

    print("KERNEL_OK")
</pallas_src>

<mosaic_0001>
module attributes {stable_mosaic.version = 11 : i64} {
  func.func @_mlp_kernel(%arg0: i32, %arg1: memref<8x32xf32, #tpu.memory_space<vmem>>, %arg2: memref<32x128xbf16, #tpu.memory_space<vmem>>, %arg3: memref<128x128xbf16, #tpu.memory_space<vmem>>, %arg4: memref<128x128xbf16, #tpu.memory_space<vmem>>, %arg5: memref<3x128xf32, #tpu.memory_space<vmem>>, %arg6: memref<8x128xf32, #tpu.memory_space<vmem>>) attributes {dimension_semantics = [#tpu.dimension_semantics<parallel>], iteration_bounds = array<i64: 1>, scalar_prefetch = 0 : i64, scratch_operands = 0 : i64, tpu.core_type = #tpu.core_type<tc>, window_params = [{transform_indices = @transform_0, window_bounds = array<i64: 8, 32>}, {pipeline_mode = #tpu.pipeline_mode<synchronous>, transform_indices = @transform_1, window_bounds = array<i64: 32, 128>}, {pipeline_mode = #tpu.pipeline_mode<synchronous>, transform_indices = @transform_2, window_bounds = array<i64: 128, 128>}, {pipeline_mode = #tpu.pipeline_mode<synchronous>, transform_indices = @transform_3, window_bounds = array<i64: 128, 128>}, {pipeline_mode = #tpu.pipeline_mode<synchronous>, transform_indices = @transform_4, window_bounds = array<i64: 3, 128>}, {transform_indices = @transform_5, window_bounds = array<i64: 8, 128>}]} {
    %c0 = arith.constant 0 : index
    %c0_0 = arith.constant 0 : index
    %0 = vector.load %arg1[%c0, %c0_0] : memref<8x32xf32, #tpu.memory_space<vmem>>, vector<8x32xf32>
    %1 = arith.truncf %0 : vector<8x32xf32> to vector<8x32xbf16>
    %c0_1 = arith.constant 0 : index
    %c0_2 = arith.constant 0 : index
    %2 = vector.load %arg2[%c0_1, %c0_2] : memref<32x128xbf16, #tpu.memory_space<vmem>>, vector<32x128xbf16>
    %cst = arith.constant dense<0.000000e+00> : vector<8x128xf32>
    %3 = tpu.matmul %1, %2, %cst {dimension_numbers = #tpu.dot_dimension_numbers<[1], [0], [0], [1], [0, 0, 1, 1], [], []>} : vector<8x32xbf16>, vector<32x128xbf16>, vector<8x128xf32> -> vector<8x128xf32>
    %c0_3 = arith.constant 0 : index
    %c0_4 = arith.constant 0 : index
    %4 = vector.load %arg5[%c0_3, %c0_4] : memref<3x128xf32, #tpu.memory_space<vmem>>, vector<1x128xf32>
    %5 = vector.broadcast %4 : vector<1x128xf32> to vector<8x128xf32>
    %6 = arith.addf %3, %5 : vector<8x128xf32>
    %cst_5 = arith.constant 0.000000e+00 : f32
    %7 = vector.broadcast %cst_5 : f32 to vector<8x128xf32>
    %8 = arith.maximumf %6, %7 : vector<8x128xf32>
    %9 = arith.truncf %8 : vector<8x128xf32> to vector<8x128xbf16>
    %c0_6 = arith.constant 0 : index
    %c0_7 = arith.constant 0 : index
    %10 = vector.load %arg3[%c0_6, %c0_7] : memref<128x128xbf16, #tpu.memory_space<vmem>>, vector<128x128xbf16>
    %cst_8 = arith.constant dense<0.000000e+00> : vector<8x128xf32>
    %11 = tpu.matmul %9, %10, %cst_8 {dimension_numbers = #tpu.dot_dimension_numbers<[1], [0], [0], [1], [0, 0, 1, 1], [], []>} : vector<8x128xbf16>, vector<128x128xbf16>, vector<8x128xf32> -> vector<8x128xf32>
    %c1 = arith.constant 1 : index
    %c0_9 = arith.constant 0 : index
    %12 = vector.load %arg5[%c1, %c0_9] : memref<3x128xf32, #tpu.memory_space<vmem>>, vector<1x128xf32>
    %13 = vector.broadcast %12 : vector<1x128xf32> to vector<8x128xf32>
    %14 = arith.addf %11, %13 : vector<8x128xf32>
    %cst_10 = arith.constant 0.000000e+00 : f32
    %15 = vector.broadcast %cst_10 : f32 to vector<8x128xf32>
    %16 = arith.maximumf %14, %15 : vector<8x128xf32>
    %17 = arith.truncf %16 : vector<8x128xf32> to vector<8x128xbf16>
    %c0_11 = arith.constant 0 : index
    %c0_12 = arith.constant 0 : index
    %18 = vector.load %arg4[%c0_11, %c0_12] : memref<128x128xbf16, #tpu.memory_space<vmem>>, vector<128x128xbf16>
    %cst_13 = arith.constant dense<0.000000e+00> : vector<8x128xf32>
    %19 = tpu.matmul %17, %18, %cst_13 {dimension_numbers = #tpu.dot_dimension_numbers<[1], [0], [0], [1], [0, 0, 1, 1], [], []>} : vector<8x128xbf16>, vector<128x128xbf16>, vector<8x128xf32> -> vector<8x128xf32>
    %c2 = arith.constant 2 : index
    %c0_14 = arith.constant 0 : index
    %20 = vector.load %arg5[%c2, %c0_14] : memref<3x128xf32, #tpu.memory_space<vmem>>, vector<1x128xf32>
    %21 = vector.broadcast %20 : vector<1x128xf32> to vector<8x128xf32>
    %22 = arith.addf %19, %21 : vector<8x128xf32>
    %c0_15 = arith.constant 0 : index
    %c0_16 = arith.constant 0 : index
    %23 = vector.load %arg6[%c0_15, %c0_16] : memref<8x128xf32, #tpu.memory_space<vmem>>, vector<8x128xf32>
    tpu.vector_store %arg6[%c0_15, %c0_16], %22 {strides = array<i32>} : memref<8x128xf32, #tpu.memory_space<vmem>>, vector<8x128xf32>,
    return
  }
  func.func @transform_0(%arg0: i32) -> (i32, i32) {
    %c0_i32 = arith.constant 0 : i32
    %c0_i32_0 = arith.constant 0 : i32
    return %arg0, %c0_i32 : i32, i32
  }
  func.func @transform_1(%arg0: i32) -> (i32, i32) {
    %c0_i32 = arith.constant 0 : i32
    %c0_i32_0 = arith.constant 0 : i32
    %c0_i32_1 = arith.constant 0 : i32
    return %c0_i32, %c0_i32_0 : i32, i32
  }
  func.func @transform_2(%arg0: i32) -> (i32, i32) {
    %c0_i32 = arith.constant 0 : i32
    %c0_i32_0 = arith.constant 0 : i32
    %c0_i32_1 = arith.constant 0 : i32
    return %c0_i32, %c0_i32_0 : i32, i32
  }
  func.func @transform_3(%arg0: i32) -> (i32, i32) {
    %c0_i32 = arith.constant 0 : i32
    %c0_i32_0 = arith.constant 0 : i32
    %c0_i32_1 = arith.constant 0 : i32
    return %c0_i32, %c0_i32_0 : i32, i32
  }
  func.func @transform_4(%arg0: i32) -> (i32, i32) {
    %c0_i32 = arith.constant 0 : i32
    %c0_i32_0 = arith.constant 0 : i32
    %c0_i32_1 = arith.constant 0 : i32
    return %c0_i32, %c0_i32_0 : i32, i32
  }
  func.func @transform_5(%arg0: i32) -> (i32, i32) {
    %c0_i32 = arith.constant 0 : i32
    %c0_i32_0 = arith.constant 0 : i32
    return %arg0, %c0_i32 : i32, i32
  }
}

</mosaic_0001>

<bundles_post_ra>
// kernel: tpu_custom_call.1
= control target key start
LH: loop header
LB: loop body
LE: loop exit
PB: predicated region body
PF: predicated region fallthrough
CT: control target
= control target key end

     0   :  { %10 = vsyncpa [#allocation3], 0  ;;  %s625_s0 = inlined_call_operand.hbm [shape: f32[8,32], index: 0, kind: input, shape index: {}]   ;;  %s626_s1 = inlined_call_operand.hbm [shape: bf16[32,128], index: 1, kind: input, shape index: {}]   ;;  %s627_s2 = inlined_call_operand.hbm [shape: bf16[128,128], index: 2, kind: input, shape index: {}]   ;;  %s628_s3 = inlined_call_operand.hbm [shape: bf16[128,128], index: 3, kind: input, shape index: {}]   ;;  %s629_s4 = inlined_call_operand.hbm [shape: f32[3,128], index: 4, kind: input, shape index: {}]   ;;  %s630_s5 = inlined_call_operand.hbm [shape: f32[8,128], index: 5, kind: output, shape index: {}]  }
   0x1   :  { %11 = vsyncpa [#allocation6], 0 }
   0x2   :  { %12 = vsyncpa [#allocation9], 0  ;;  %s29_s20 = sshll.u32 %s626_s1, 4  ;;  %s30_s20 = int_to_ptr.hbm [resolvable:$true] %s29_s20 }
   0x3   :  { %13 = vsyncpa [#allocation4], 0  ;;  %s569_s21 = smov [#allocation5]   ;;  %s55_s25 = sshll.u32 %s628_s3, 4  ;;  %s56_s25 = int_to_ptr.hbm [resolvable:$true] %s55_s25 }
   0x4   :  { %s31_s22 = sshll.u32 %s569_s21, 4  ;;  %s570_s26 = smov 64   ;;  %s32_s22 = int_to_ptr.vmem [resolvable:$true] %s31_s22 }
   0x5   :  { %s571_s27 = smov 4   ;;  %s572_s28 = smov [#allocation8]  }
   0x6   :  { %37 = dma.hbm_to_vmem [thread:$0]  %s30_s20, 256, %s32_s22, [#allocation6], %s570_s26, %s570_s26, %s571_s27  }
   0x7   :  { %s57_s29 = sshll.u32 %s572_s28, 4  ;;  %s19_s7 = sshll.u32 %s625_s0, 4  ;;  %s58_s29 = int_to_ptr.vmem [resolvable:$true] %s57_s29  ;;  %s20_s7 = int_to_ptr.hbm [resolvable:$true] %s19_s7 }
   0x8   :  { %63 = dma.hbm_to_vmem [thread:$0]  %s56_s25, 1024, %s58_s29, [#allocation9], %s570_s26, %s570_s26, %s571_s27  }
   0x9   :  { %s42_s9 = sshll.u32 %s627_s2, 4  ;;  %s573_s10 = smov [#allocation2]   ;;  %s43_s9 = int_to_ptr.hbm [resolvable:$true] %s42_s9 }
   0xa   :  { %s21_s11 = sshll.u32 %s573_s10, 4  ;;  %s574_s3 = smov [#allocation7]   ;;  %s22_s11 = int_to_ptr.vmem [resolvable:$true] %s21_s11 }
   0xb   :  { %24 = dma.hbm_to_vmem [thread:$0]  %s20_s7, 128, %s22_s11, [#allocation3]  }
   0xc   :  { %s44_s12 = sshll.u32 %s574_s3, 4  ;;  %s69_s15 = sshll.u32 %s629_s4, 4  ;;  %s45_s12 = int_to_ptr.vmem [resolvable:$true] %s44_s12  ;;  %s70_s15 = int_to_ptr.hbm [resolvable:$true] %s69_s15 }
   0xd   :  { %50 = dma.hbm_to_vmem [thread:$0]  %s43_s9, 1024, %s45_s12, [#allocation6], %s570_s26, %s570_s26, %s571_s27  }
   0xe   :  { %s575_s0 = smov [#allocation10]  }
   0xf   :  { %s71_s16 = sshll.u32 %s575_s0, 4  ;;  %s72_s16 = int_to_ptr.vmem [resolvable:$true] %s71_s16 }
  0x10   :  { %74 = dma.hbm_to_vmem [thread:$0]  %s70_s15, 64, %s72_s16, [#allocation9]  }
  0x11   :  { %561 = dma.done.wait [#allocation3], 128  }
  0x12   :  { %562 = vsyncadd [#allocation3], 4294967168 }
  0x13   :  { %563 = dma.done.wait [#allocation6], 1280  }
  0x14   :  { %564 = vsyncadd [#allocation6], 4294966016 }
  0x15   :  { %565 = dma.done.wait [#allocation9], 1088  }
  0x16   :  { %566 = vsyncadd [#allocation9], 4294966208  ;;  %v389_v0 = vld [vmem:[#allocation5 + $0x8] sm:$0xff]  ;;  %v388_v2 = vld [vmem:[#allocation5] sm:$0xff]  ;;  %vm116_vm0 = vcmask 261120   ;;  %s576_s2 = smov [#allocation11]  }
  0x17   :  { %v397_v1 = vld [vmem:[#allocation7 + $0x38] sm:$0xff]  ;;  %126 = vmatpush.bf16.msra.mxu0 %v389_v0  ;;  %v96_v3 = vld [vmem:[#allocation2] sm:$0xff]  ;;  %v396_v4 = vld [vmem:[#allocation7 + $0x30] sm:$0xff]  ;;  %s301_s4 = sshll.u32 %s576_s2, 4  ;;  %s303_s19 = sshll.u32 %s630_s5, 4  ;;  %s302_s4 = int_to_ptr.vmem [resolvable:$true] %s301_s4  ;;  %s304_s19 = int_to_ptr.hbm [resolvable:$true] %s303_s19 }
  0x18   :  { %201 = vmatpush.bf16.msra.mxu1 %v397_v1  ;;  %v97_v5 = vpack.c.bf16 %v96_v3, %v96_v3  ;;  %v395_v6 = vld [vmem:[#allocation7 + $0x28] sm:$0xff]  ;;  %v394_v7 = vld [vmem:[#allocation7 + $0x20] sm:$0xff]  ;;  %v393_v8 = vld [vmem:[#allocation7 + $0x18] sm:$0xff] }
  0x19   :  { %v392_v9 = vld [vmem:[#allocation7 + $0x10] sm:$0xff]  ;;  %v391_v10 = vld [vmem:[#allocation7 + $0x8] sm:$0xff]  ;;  %v390_v11 = vld [vmem:[#allocation7] sm:$0xff] }
  0x1a   :  { %v405_v12 = vld [vmem:[#allocation8 + $0x38] sm:$0xff]  ;;  %v404_v13 = vld [vmem:[#allocation8 + $0x30] sm:$0xff]  ;;  %v403_v14 = vld [vmem:[#allocation8 + $0x28] sm:$0xff] }
  0x1b   :  { %127 = vmatpush.bf16.msra.mxu0 %v388_v2  ;;  %282 = vmatpush.bf16.msra.mxu2 %v405_v12  ;;  %v402_v15 = vld [vmem:[#allocation8 + $0x20] sm:$0xff]  ;;  %v401_v16 = vld [vmem:[#allocation8 + $0x18] sm:$0xff]  ;;  %v400_v17 = vld [vmem:[#allocation8 + $0x10] sm:$0xff] }
  0x1c   :  { %202 = vmatpush.bf16.msra.mxu1 %v396_v4  ;;  %v414_v18 = vld [vmem:[#allocation10] ss:$0 sm:$0xff]  ;;  %v399_v24 = vld [vmem:[#allocation8 + $0x8] sm:$0xff]  ;;  %v415_v26 = vld [vmem:[#allocation10 + $0x1] ss:$0 sm:$0xff] }
  0x1d   :  { %v398_v25 = vld [vmem:[#allocation8] sm:$0xff] }
  0x1e   :  { %323 = vmatmul.msk.bf16.vlgmr.msra.gmra.mxu0 %vm116_vm0, %v97_v5  ;;  %v416_v32 = vld [vmem:[#allocation10 + $0x2] ss:$0 sm:$0xff] }
  0x1f   :  { %283 = vmatpush.bf16.msra.mxu2 %v404_v13 }
  0x20   :  { %203 = vmatpush.bf16.msra.mxu1 %v395_v6 }
  0x23   :  { %284 = vmatpush.bf16.msra.mxu2 %v403_v14 }
  0x24   :  { %204 = vmatpush.bf16.msra.mxu1 %v394_v7 }
  0x27   :  { %285 = vmatpush.bf16.msra.mxu2 %v402_v15 }
  0x28   :  { %205 = vmatpush.bf16.msra.mxu1 %v393_v8 }
  0x2b   :  { %286 = vmatpush.bf16.msra.mxu2 %v401_v16 }
  0x2c   :  { %206 = vmatpush.bf16.msra.mxu1 %v392_v9 }
  0x2f   :  { %287 = vmatpush.bf16.msra.mxu2 %v400_v17 }
  0x30   :  { %207 = vmatpush.bf16.msra.mxu1 %v391_v10 }
  0x33   :  { %288 = vmatpush.bf16.msra.mxu2 %v399_v24 }
  0x34   :  { %208 = vmatpush.bf16.msra.mxu1 %v390_v11 }
  0x37   :  { %289 = vmatpush.bf16.msra.mxu2 %v398_v25 }
  0x9b   :  { %v129_v19 = vpop.f32.mrf.mxu0 }
  0x9c   :  { %v130_v20 = vadd.f32 %v414_v18, %v129_v19 }
  0x9e   :  { %v133_v21 = vmax.f32 %v130_v20, 0.0 }
  0xa0   :  { %v134_v22 = vpack.c.bf16 %v133_v21, %v133_v21 }
  0xa2   :  { %209 = vmatmul.bf16.vlgmr.msra.gmra.mxu1 %v134_v22 }
  0xa3   :  { %v131_v23 = vpop.f32.mrf.mxu0 }
 0x11f   :  { %v210_v27 = vpop.f32.mrf.mxu1 }
 0x120   :  { %v211_v28 = vadd.f32 %v415_v26, %v210_v27 }
 0x122   :  { %v214_v29 = vmax.f32 %v211_v28, 0.0 }
 0x124   :  { %v215_v30 = vpack.c.bf16 %v214_v29, %v214_v29 }
 0x126   :  { %290 = vmatmul.bf16.vlgmr.msra.gmra.mxu2 %v215_v30 }
 0x127   :  { %v212_v31 = vpop.f32.mrf.mxu1 }
 0x1a9   :  { %v291_v33 = vpop.f32.mrf.mxu2 }
 0x1aa   :  { %v292_v34 = vadd.f32 %v416_v32, %v291_v33 }
 0x1ac   :  { %295 = vst [vmem:[#allocation11] sm:$0xff] %v292_v34 }
 0x1ad   :  { %306 = dma.vmem_to_hbm [thread:$0]  %s302_s4, 128, %s304_s19, [#allocation4]  }
 0x1b1   :  { %v293_v35 = vpop.f32.mrf.mxu2 }
 0x1b2   :  { %567 = dma.done.wait [#allocation4], 128  }
 0x1b3   :  { %568 = vsyncadd [#allocation4], 4294967168 }
 0x1b4   :  { %311 = vsyncpa [#allocation3], 1 }
 0x1b5   :  { %312 = vsyncpa [#allocation6], 1 }
 0x1b6   :  { %313 = vsyncpa [#allocation9], 1 }
 0x1b7   :  { %314 = vsyncpa [#allocation4], 1 }

</bundles_post_ra>
